<compile_context>
chip_gen: v7x
topology: tpu7x:2x2x1
jax: 0.10.0
libtpu: 0.0.40
codegen_flags: <defaults>
</compile_context>

<pallas_src>
import functools
import warnings

import jax
import jax.numpy as jnp
from jax.experimental import pallas as pl
from jax.experimental.pallas import tpu as pltpu

# Suppress the benign "donated buffers were not usable" warning that can fire
# on fallback (padded) paths where donation cannot be honoured.
warnings.filterwarnings("ignore", message=".*donat.*")

_VMEM_LIMIT_BYTES = 48 * 1024 * 1024   # <= 64 MiB physical on v7x; plenty on v5e/v6e


# ---------------------------------------------------------------------------
# Kernels
# ---------------------------------------------------------------------------

def _adapter_kernel(x_ref, w_ref, b_ref, acc_ref, out_ref):
    # x_ref:   (Cin, TP)    NCHW pixel tile (batch dim squeezed)
    # w_ref:   (Cout, Cin)  1x1-conv weight with BN scale folded in
    # b_ref:   (Cout, 1)    folded (conv bias + BN) bias, f32
    # acc_ref: (Cout, TP)   fused_accumulator tile
    # out_ref: (Cout, TP)   aliased with acc (in-place accumulate)
    y = jnp.dot(w_ref[...], x_ref[...], preferred_element_type=jnp.float32)
    y = jnp.maximum(y + b_ref[...].astype(jnp.float32), 0.0)      # BN bias + ReLU
    out_ref[...] = (acc_ref[...].astype(jnp.float32) + y).astype(out_ref.dtype)


def _adapter_both_kernel(x32_ref, w32_ref, b32_ref,
                         x64_ref, w64_ref, b64_ref,
                         acc_ref, out_ref):
    # Fused: acc + relu(conv32(x32)) + relu(conv64(x64)) in one pass, so the
    # Cout=256 accumulator is streamed through HBM only once.  Chained into a
    # single running expression so only one f32 (Cout, TP) temporary is live.
    acc = acc_ref[...].astype(jnp.float32)
    y = jnp.dot(w32_ref[...], x32_ref[...], preferred_element_type=jnp.float32)
    acc = acc + jnp.maximum(y + b32_ref[...].astype(jnp.float32), 0.0)
    y = jnp.dot(w64_ref[...], x64_ref[...], preferred_element_type=jnp.float32)
    acc = acc + jnp.maximum(y + b64_ref[...].astype(jnp.float32), 0.0)
    out_ref[...] = acc.astype(out_ref.dtype)


# ---------------------------------------------------------------------------
# Tiling helpers
# ---------------------------------------------------------------------------

def _round_up(x: int, m: int) -> int:
    return ((x + m - 1) // m) * m


def _choose_grid(n: int, hw: int, tp_max: int):
    """Pick a lane-dense (multiple-of-128) pixel tile and the (possibly padded)
    HW extent it tiles.  Prefers exact divisor tiles (no padding); pads for
    ragged HW.  Nudges the tile so the total parallel grid is even (v7x has
    two TensorCores)."""
    tp_max = max(128, (tp_max // 128) * 128)
    if hw <= tp_max:
        tp = _round_up(hw, 128)
        hw_pad = tp
    else:
        tp = None
        if hw % 128 == 0:
            cand = tp_max
            while cand >= 512:
                if hw % cand == 0:
                    tp = cand
                    break
                cand -= 128
        if tp is None:
            # Ragged HW (or no decent divisor): fixed tile + host-side padding.
            tp = tp_max
            hw_pad = _round_up(hw, tp)
        else:
            hw_pad = hw
    # Keep the parallel grid even so both v7x TensorCores get balanced work.
    if (n * (hw_pad // tp)) % 2 == 1 and tp % 256 == 0:
        tp //= 2
    return tp, hw_pad


def _maybe_pad_last(x, hw_pad: int):
    hw = x.shape[-1]
    if hw_pad == hw:
        return x
    # TODO(synk): ragged-HW fallback pays one pad/slice copy; SAM2 feature maps
    # (HW a multiple of 128) never hit this path.
    return jnp.pad(x, ((0, 0), (0, 0), (0, hw_pad - hw)))


# ---------------------------------------------------------------------------
# pallas_call wrappers (jitted; accumulator is DONATED -> true in-place update)
# ---------------------------------------------------------------------------

@functools.partial(jax.jit, static_argnames=("tp_max",), donate_argnums=(3,))
def _fused_adapter(feat, w, b, acc, *, tp_max=4096):
    """feat: (N, Cin, H, W);  w: (Cout, Cin);  b: (Cout, 1);  acc: (N, Cout, H, W)."""
    n, cin, h, wd = feat.shape
    cout = acc.shape[1]
    hw = h * wd
    tp, hw_pad = _choose_grid(n, hw, tp_max)

    x = _maybe_pad_last(feat.reshape(n, cin, hw), hw_pad)
    a = _maybe_pad_last(acc.reshape(n, cout, hw), hw_pad)

    out = pl.pallas_call(
        _adapter_kernel,
        out_shape=jax.ShapeDtypeStruct((n, cout, hw_pad), acc.dtype),
        grid_spec=pltpu.PrefetchScalarGridSpec(
            num_scalar_prefetch=0,
            grid=(n, hw_pad // tp),
            in_specs=[
                pl.BlockSpec((None, cin, tp), lambda i, t: (i, 0, t)),   # x
                pl.BlockSpec((cout, cin), lambda i, t: (0, 0)),          # folded weight
                pl.BlockSpec((cout, 1), lambda i, t: (0, 0)),            # folded bias
                pl.BlockSpec((None, cout, tp), lambda i, t: (i, 0, t)),  # accumulator
            ],
            out_specs=pl.BlockSpec((None, cout, tp), lambda i, t: (i, 0, t)),
        ),
        input_output_aliases={3: 0},   # acc -> out (in-place accumulate)
        compiler_params=pltpu.CompilerParams(
            dimension_semantics=("parallel", "parallel"),
            vmem_limit_bytes=_VMEM_LIMIT_BYTES),
    )(x, w, b, a)

    if hw_pad != hw:
        out = out[:, :, :hw]
    return out.reshape(n, cout, h, wd)


@functools.partial(jax.jit, static_argnames=("tp_max",), donate_argnums=(6,))
def _fused_both_adapters(feat32, w32, b32, feat64, w64, b64, acc, *, tp_max=4096):
    """Both adapters + accumulate in a single pass over the accumulator."""
    n, _, h, wd = feat32.shape
    cout = acc.shape[1]
    hw = h * wd
    tp, hw_pad = _choose_grid(n, hw, tp_max)

    x32 = _maybe_pad_last(feat32.reshape(n, 32, hw), hw_pad)
    x64 = _maybe_pad_last(feat64.reshape(n, 64, hw), hw_pad)
    a = _maybe_pad_last(acc.reshape(n, cout, hw), hw_pad)

    def pix_spec(c):
        return pl.BlockSpec((None, c, tp), lambda i, t: (i, 0, t))

    def const_spec(r, c):
        return pl.BlockSpec((r, c), lambda i, t: (0, 0))

    out = pl.pallas_call(
        _adapter_both_kernel,
        out_shape=jax.ShapeDtypeStruct((n, cout, hw_pad), acc.dtype),
        grid_spec=pltpu.PrefetchScalarGridSpec(
            num_scalar_prefetch=0,
            grid=(n, hw_pad // tp),
            in_specs=[
                pix_spec(32), const_spec(cout, 32), const_spec(cout, 1),
                pix_spec(64), const_spec(cout, 64), const_spec(cout, 1),
                pix_spec(cout),                                   # accumulator
            ],
            out_specs=pix_spec(cout),
        ),
        input_output_aliases={6: 0},   # acc -> out
        compiler_params=pltpu.CompilerParams(
            dimension_semantics=("parallel", "parallel"),
            vmem_limit_bytes=_VMEM_LIMIT_BYTES),
    )(x32, w32, b32, x64, w64, b64, a)

    if hw_pad != hw:
        out = out[:, :, :hw]
    return out.reshape(n, cout, h, wd)


# ---------------------------------------------------------------------------
# Module
# ---------------------------------------------------------------------------

def _make_adapter_params(key, cin, cout):
    """Deterministic stand-ins for Conv2d(cin, cout, 1) + BatchNorm2d(cout),
    with the BN scale folded into the conv weight (eval mode).  f32."""
    k_w, k_b, k_g, k_be, k_m, k_v = jax.random.split(key, 6)
    conv_w = 0.02 * jax.random.normal(k_w, (cout, cin), jnp.float32)   # (Cout, Cin)
    conv_b = 0.01 * jax.random.normal(k_b, (cout,), jnp.float32)
    bn_gamma = 1.0 + 0.05 * jax.random.normal(k_g, (cout,), jnp.float32)
    bn_beta = 0.05 * jax.random.normal(k_be, (cout,), jnp.float32)
    bn_mean = 0.05 * jax.random.normal(k_m, (cout,), jnp.float32)
    bn_var = 1.0 + 0.1 * jnp.abs(jax.random.normal(k_v, (cout,), jnp.float32))
    eps = 1e-5
    #   y = ((W x + b) - mean) / sqrt(var+eps) * gamma + beta
    #     = (scale*W) x + ((b - mean) * scale + beta)
    scale = bn_gamma / jnp.sqrt(bn_var + eps)
    return {
        "w": conv_w * scale[:, None],                              # (Cout, Cin)
        "b": ((conv_b - bn_mean) * scale + bn_beta)[:, None],      # (Cout, 1), f32
    }


class SimpleHighResFusionPallas:
    """Pallas port of SimpleHighResFusion (NCHW in, NCHW out).

    NOTE: like the torch module's in-place `fused_accumulator += feat`, the
    accumulator passed to __call__/forward_both is DONATED (its buffer is
    reused for the output) and must not be used by the caller afterwards.
    """

    def __init__(self, out_channels: int = 256, key=jax.random.PRNGKey(0),
                 pixel_tile: int = 4096, dtype=jnp.float32):
        k32, k64 = jax.random.split(key)
        self.out_channels = out_channels
        self.pixel_tile = pixel_tile        # tunable pixel tile (multiple of 128)
        self.dtype = dtype
        p32 = _make_adapter_params(k32, 32, out_channels)
        p64 = _make_adapter_params(k64, 64, out_channels)
        # Weights stream in the chosen dtype (bf16 halves their HBM traffic);
        # bias stays f32 (256 floats, added in f32 inside the kernel anyway).
        self.params = {
            32: {"w": p32["w"].astype(dtype), "b": p32["b"]},
            64: {"w": p64["w"].astype(dtype), "b": p64["b"]},
        }

    def __call__(self, feat, fused_accumulator):
        # feat:              (N, Cin, H, W), Cin in {32, 64}
        # fused_accumulator: (N, Cout, H, W)  -- donated!
        cin = feat.shape[1]
        if cin not in self.params:
            raise ValueError(f"Unsupported input channels: {cin}")
        p = self.params[cin]
        return _fused_adapter(feat, p["w"], p["b"], fused_accumulator,
                              tp_max=self.pixel_tile)

    def forward_both(self, feat32, feat64, fused_accumulator):
        """Fused path when both adapters run back-to-back on the same
        accumulator (requires matching spatial shapes): halves the dominant
        accumulator read/write traffic versus two chained calls."""
        n, c32, h, w = feat32.shape
        n64, c64, h64, w64 = feat64.shape
        if (c32, c64) != (32, 64) or (n, h, w) != (n64, h64, w64):
            raise ValueError("forward_both expects matching 32/64-channel feats")
        p32, p64 = self.params[32], self.params[64]
        return _fused_both_adapters(feat32, p32["w"], p32["b"],
                                    feat64, p64["w"], p64["b"],
                                    fused_accumulator, tp_max=self.pixel_tile)


# ---------------------------------------------------------------------------
# Self-test
# ---------------------------------------------------------------------------

if __name__ == "__main__":
    key = jax.random.PRNGKey(0)
    k_feat32, k_feat64, k_acc = jax.random.split(key, 3)

    N, H, W = 2, 16, 16
    COUT = 256

    module = SimpleHighResFusionPallas(out_channels=COUT, key=jax.random.PRNGKey(0))

    feat32 = jax.random.normal(k_feat32, (N, 32, H, W), jnp.float32)
    feat64 = jax.random.normal(k_feat64, (N, 64, H, W), jnp.float32)
    acc = jax.random.normal(k_acc, (N, COUT, H, W), jnp.float32)

    # Pure-JAX reference (computed first: the kernel donates its accumulator).
    def ref_one(feat, acc_, p):
        y = jnp.einsum("oc,nchw->nohw", p["w"].astype(jnp.float32),
                       feat.astype(jnp.float32),
                       precision=jax.lax.Precision.HIGHEST)
        y = y + p["b"].reshape(1, -1, 1, 1)
        return acc_.astype(jnp.float32) + jnp.maximum(y, 0.0)

    ref32 = ref_one(feat32, acc, module.params[32])
    ref64 = ref_one(feat64, ref32, module.params[64])

    # Chained path (matches the torch forward semantics).  Accumulators are
    # donated, so pass a fresh copy and do not reuse buffers afterwards.
    out32 = module(feat32, acc + 0.0)
    assert out32.shape == (N, COUT, H, W)
    assert jnp.allclose(out32, ref32, atol=3e-3, rtol=3e-3)
    out64 = module(feat64, out32)          # out32 is donated here; not used again
    jax.block_until_ready(out64)
    assert out64.shape == (N, COUT, H, W)
    assert jnp.allclose(out64, ref64, atol=3e-3, rtol=3e-3)

    # Single-pass fused variant (both adapters + accumulate in one kernel).
    out_both = module.forward_both(feat32, feat64, acc + 0.0)
    jax.block_until_ready(out_both)
    assert out_both.shape == (N, COUT, H, W)
    assert jnp.allclose(out_both, ref64, atol=3e-3, rtol=3e-3)

    # bf16 streaming variant (halves HBM traffic; f32 accumulation on chip).
    module_bf = SimpleHighResFusionPallas(out_channels=COUT,
                                          key=jax.random.PRNGKey(0),
                                          dtype=jnp.bfloat16)
    out_bf = module_bf.forward_both(feat32.astype(jnp.bfloat16),
                                    feat64.astype(jnp.bfloat16),
                                    acc.astype(jnp.bfloat16))
    jax.block_until_ready(out_bf)
    assert jnp.allclose(out_bf.astype(jnp.float32), ref64, atol=8e-2, rtol=8e-2)

    print("KERNEL_OK")
</pallas_src>

<mosaic_0001>
module attributes {stable_mosaic.version = 11 : i64} {
  func.func @_adapter_kernel(%arg0: i32, %arg1: i32, %arg2: memref<1x32x256xf32, #tpu.memory_space<vmem>>, %arg3: memref<256x32xf32, #tpu.memory_space<vmem>>, %arg4: memref<256x1xf32, #tpu.memory_space<vmem>>, %arg5: memref<1x256x256xf32, #tpu.memory_space<vmem>>, %arg6: memref<1x256x256xf32, #tpu.memory_space<vmem>>) attributes {dimension_semantics = [#tpu.dimension_semantics<parallel>, #tpu.dimension_semantics<parallel>], iteration_bounds = array<i64: 2, 1>, scalar_prefetch = 0 : i64, scratch_operands = 0 : i64, tpu.core_type = #tpu.core_type<tc>, window_params = [{transform_indices = @transform_0, window_bounds = array<i64: 1, 32, 256>}, {pipeline_mode = #tpu.pipeline_mode<synchronous>, transform_indices = @transform_1, window_bounds = array<i64: 256, 32>}, {pipeline_mode = #tpu.pipeline_mode<synchronous>, transform_indices = @transform_2, window_bounds = array<i64: 256, 1>}, {transform_indices = @transform_3, window_bounds = array<i64: 1, 256, 256>}, {transform_indices = @transform_4, window_bounds = array<i64: 1, 256, 256>}]} {
    %c0 = arith.constant 0 : index
    %c0_0 = arith.constant 0 : index
    %0 = vector.load %arg3[%c0, %c0_0] : memref<256x32xf32, #tpu.memory_space<vmem>>, vector<256x32xf32>
    %c0_1 = arith.constant 0 : index
    %c0_2 = arith.constant 0 : index
    %c0_3 = arith.constant 0 : index
    %1 = vector.load %arg2[%c0_1, %c0_2, %c0_3] : memref<1x32x256xf32, #tpu.memory_space<vmem>>, vector<1x32x256xf32>
    %2 = vector.shape_cast %1 : vector<1x32x256xf32> to vector<32x256xf32>
    %cst = arith.constant dense<0.000000e+00> : vector<256x256xf32>
    %3 = tpu.matmul %0, %2, %cst {dimension_numbers = #tpu.dot_dimension_numbers<[1], [0], [0], [1], [0, 0, 1, 1], [], []>} : vector<256x32xf32>, vector<32x256xf32>, vector<256x256xf32> -> vector<256x256xf32>
    %c0_4 = arith.constant 0 : index
    %c0_5 = arith.constant 0 : index
    %4 = vector.load %arg4[%c0_4, %c0_5] : memref<256x1xf32, #tpu.memory_space<vmem>>, vector<256x1xf32>
    %5 = vector.broadcast %4 : vector<256x1xf32> to vector<256x256xf32>
    %6 = arith.addf %3, %5 : vector<256x256xf32>
    %cst_6 = arith.constant 0.000000e+00 : f32
    %7 = vector.broadcast %cst_6 : f32 to vector<256x256xf32>
    %8 = arith.maximumf %6, %7 : vector<256x256xf32>
    %c0_7 = arith.constant 0 : index
    %c0_8 = arith.constant 0 : index
    %c0_9 = arith.constant 0 : index
    %9 = vector.load %arg5[%c0_7, %c0_8, %c0_9] : memref<1x256x256xf32, #tpu.memory_space<vmem>>, vector<1x256x256xf32>
    %10 = vector.shape_cast %9 : vector<1x256x256xf32> to vector<256x256xf32>
    %11 = arith.addf %10, %8 : vector<256x256xf32>
    %c0_10 = arith.constant 0 : index
    %c0_11 = arith.constant 0 : index
    %c0_12 = arith.constant 0 : index
    %12 = vector.load %arg6[%c0_10, %c0_11, %c0_12] : memref<1x256x256xf32, #tpu.memory_space<vmem>>, vector<1x256x256xf32>
    %13 = vector.shape_cast %12 : vector<1x256x256xf32> to vector<256x256xf32>
    %14 = vector.shape_cast %11 : vector<256x256xf32> to vector<1x256x256xf32>
    tpu.vector_store %arg6[%c0_10, %c0_11, %c0_12], %14 {strides = array<i32>} : memref<1x256x256xf32, #tpu.memory_space<vmem>>, vector<1x256x256xf32>,
    return
  }
  func.func @transform_0(%arg0: i32, %arg1: i32) -> (i32, i32, i32) {
    %c0_i32 = arith.constant 0 : i32
    %c0_i32_0 = arith.constant 0 : i32
    return %arg0, %c0_i32, %arg1 : i32, i32, i32
  }
  func.func @transform_1(%arg0: i32, %arg1: i32) -> (i32, i32) {
    %c0_i32 = arith.constant 0 : i32
    %c0_i32_0 = arith.constant 0 : i32
    %c0_i32_1 = arith.constant 0 : i32
    return %c0_i32, %c0_i32_0 : i32, i32
  }
  func.func @transform_2(%arg0: i32, %arg1: i32) -> (i32, i32) {
    %c0_i32 = arith.constant 0 : i32
    %c0_i32_0 = arith.constant 0 : i32
    %c0_i32_1 = arith.constant 0 : i32
    return %c0_i32, %c0_i32_0 : i32, i32
  }
  func.func @transform_3(%arg0: i32, %arg1: i32) -> (i32, i32, i32) {
    %c0_i32 = arith.constant 0 : i32
    %c0_i32_0 = arith.constant 0 : i32
    return %arg0, %c0_i32, %arg1 : i32, i32, i32
  }
  func.func @transform_4(%arg0: i32, %arg1: i32) -> (i32, i32, i32) {
    %c0_i32 = arith.constant 0 : i32
    %c0_i32_0 = arith.constant 0 : i32
    return %arg0, %c0_i32, %arg1 : i32, i32, i32
  }
}

</mosaic_0001>

<bundles_post_ra>
// kernel: _fused_adapter.1
= control target key start
LH: loop header
LB: loop body
LE: loop exit
PB: predicated region body
PF: predicated region fallthrough
CT: control target
= control target key end

     0   :  { %s1359_s15 = smov 0   ;;  %s1361_s16 = smov 0   ;;  %s2055_s0 = inlined_call_operand.vmem [shape: f32[2,32,256], index: 0, kind: input, shape index: {}]   ;;  %s2056_s1 = inlined_call_operand.vmem [shape: f32[256,32], index: 1, kind: input, shape index: {}]   ;;  %s2057_s2 = inlined_call_operand.vmem [shape: f32[256,1], index: 2, kind: input, shape index: {}]   ;;  %s2058_s3 = inlined_call_operand.vmem [shape: f32[2,256,256], index: 3, kind: input, shape index: {}, may-alias: {3,4}]   ;;  %s2059_s4 = inlined_call_operand.vmem [shape: f32[2,256,256], index: 4, kind: output, shape index: {}, may-alias: {3,4}]  }
   0x1   :  { %s1363_s17 = smov 0  }
   0x2 LB: > { %s26_s18 = sadd.s32 1, %s1326_s16  ;;  %p1224_p0 = scmp.ge.s32.totalorder %s1330_s17, 1  ;;  %s1330_s17 = sphi %s1363_s17, %s14_s17   ;;  %s1326_s16 = sphi %s1361_s16, %s2137_s16   ;;  %s1322_s15 = sphi %s1359_s15, %s2136_s15  }
   0x3   : > { %p28_p1 = scmp.ge.s32.totalorder %s26_s18, 2  ;;  %p200_p2 = scmp.lt.s32.totalorder %s1330_s17, 3 }
   0x5   : > { %s2139_s18 = smov (%p28_p1, %s26_s18), 0  ;;  %p201_p3 = pnand %p1224_p0, %p200_p2 }
   0x7   : > { %204 = sbr.rel (%p201_p3) target bundleno = 311 (0x137), region = 36 }
   0xe   : > { %p244_p4 = scmp.lt.s32.totalorder %s1322_s15, 1  ;;  %v1332_v0 = vmov 0.0   ;;  %v1333_v1 = vmov 0   ;;  %v315_v2 = vld [vmem:[%s2057_s2 + $0x10] sm:$0xff]  ;;  %v313_v3 = vld [vmem:[%s2057_s2] sm:$0xff]  ;;  %v316_v15 = vld [vmem:[%s2057_s2 + $0x18] sm:$0xff] }
   0xf   : > { %666 = vmatprep.mubr.f32.mxu0 %v1332_v0  ;;  %762 = vmatprep.mubr.f32.mxu1 %v1332_v0  ;;  %v314_v16 = vld [vmem:[%s2057_s2 + $0x8] sm:$0xff]  ;;  %v317_v19 = vld [vmem:[%s2057_s2 + $0x20] sm:$0xff]  ;;  %vm505_vm0 = vcmask 261120   ;;  %v320_v22 = vld [vmem:[%s2057_s2 + $0x38] sm:$0xff] }
  0x10   : > { %s2141_s15 = smov (!%p244_p4, %s1322_s15), 1  ;;  %1307 = vset.pattern.permute.xlu1 %v1333_v1  ;;  %1306 = vset.pattern.permute.xlu0 %v1333_v1  ;;  %v318_v18 = vld [vmem:[%s2057_s2 + $0x28] sm:$0xff]  ;;  %v273_v20 = vld [vmem:[%s2056_s1] sm:$0xff]  ;;  %v319_v23 = vld [vmem:[%s2057_s2 + $0x30] sm:$0xff] }
  0x11   : > { %s1265_s19 = sshll.u32 %s2141_s15, 6  ;;  %357 = vperm.xlu1 %1307, %v315_v2   ;;  %347 = vperm.xlu0 %1306, %v313_v3   ;;  %v289_v21 = vld [vmem:[%s2056_s1 + $0x80] sm:$0xff]  ;;  %v274_v24 = vld [vmem:[%s2056_s1 + $0x8] sm:$0xff]  ;;  %v275_v28 = vld [vmem:[%s2056_s1 + $0x10] sm:$0xff] }
  0x12   : > { %s251_s24 = scalar_lea.vmem %s2055_s0, %s1265_s19  ;;  %v290_v25 = vld [vmem:[%s2056_s1 + $0x88] sm:$0xff]  ;;  %v321_v27 = vld [vmem:[%s2057_s2 + $0x40] sm:$0xff]  ;;  %v291_v29 = vld [vmem:[%s2056_s1 + $0x90] sm:$0xff]  ;;  %s1266_s19 = sshll.u32 %s2141_s15, 9 }
  0x13   : > { %v306_v4 = vld [vmem:[%s251_s24 + $0x8] sm:$0xff]  ;;  %v308_v5 = vld [vmem:[%s251_s24 + $0x18] sm:$0xff]  ;;  %v305_v6 = vld [vmem:[%s251_s24] sm:$0xff]  ;;  %s1675_s22 = scalar_lea.vmem %s2058_s3, %s1266_s19  ;;  %s1878_s25 = scalar_lea.vmem %s2059_s4, %s1266_s19 }
  0x14   : > { %v1268_v7 = vpack.c.bf16 %v308_v5, %v306_v4  ;;  %v307_v8 = vld [vmem:[%s251_s24 + $0x10] sm:$0xff]  ;;  %v310_v9 = vld [vmem:[%s251_s24 + $0x28] sm:$0xff]  ;;  %v312_v10 = vld [vmem:[%s251_s24 + $0x38] sm:$0xff] }
  0x15   : > { %v1270_v11 = vpack.c.bf16 %v307_v8, %v305_v6  ;;  %v1272_v12 = vpack.c.bf16 %v312_v10, %v310_v9  ;;  %v309_v13 = vld [vmem:[%s251_s24 + $0x20] sm:$0xff]  ;;  %v311_v14 = vld [vmem:[%s251_s24 + $0x30] sm:$0xff]  ;;  %362 = vperm.xlu1 %1307, %v316_v15   ;;  %352 = vperm.xlu0 %1306, %v314_v16   ;;  %v322_v26 = vld [vmem:[%s2057_s2 + $0x48] sm:$0xff] }
  0x16   : > { %1269 = vmatprep.subr.bf16.mxu0 %v1268_v7  ;;  %1276 = vmatprep.subr.bf16.mxu1 %v1268_v7  ;;  %v1274_v17 = vpack.c.bf16 %v311_v14, %v309_v13  ;;  %v324_v30 = vld [vmem:[%s2057_s2 + $0x58] sm:$0xff]  ;;  %v323_v31 = vld [vmem:[%s2057_s2 + $0x50] sm:$0xff]  ;;  %v326_v34 = vld [vmem:[%s2057_s2 + $0x68] sm:$0xff] }
  0x17   : > { %1271 = vmatpush1.bf16.msra.mxu0 %v1270_v11  ;;  %1278 = vmatpush1.bf16.msra.mxu1 %v1270_v11  ;;  %v276_v32 = vld [vmem:[%s2056_s1 + $0x18] sm:$0xff]  ;;  %v325_v35 = vld [vmem:[%s2057_s2 + $0x60] sm:$0xff]  ;;  %v327_v39 = vld [vmem:[%s2057_s2 + $0x70] sm:$0xff] }
  0x18   : > { %1273 = vmatprep.subr.bf16.mxu0 %v1272_v12  ;;  %1277 = vmatprep.subr.bf16.mxu1 %v1272_v12  ;;  %v292_v33 = vld [vmem:[%s2056_s1 + $0x98] sm:$0xff]  ;;  %v277_v36 = vld [vmem:[%s2056_s1 + $0x20] sm:$0xff]  ;;  %v278_v40 = vld [vmem:[%s2056_s1 + $0x28] sm:$0xff] }
  0x19   : > { %372 = vperm.xlu1 %1307, %v318_v18   ;;  %367 = vperm.xlu0 %1306, %v317_v19   ;;  %v293_v37 = vld [vmem:[%s2056_s1 + $0xa0] sm:$0xff]  ;;  %v328_v38 = vld [vmem:[%s2057_s2 + $0x78] sm:$0xff]  ;;  %v294_v41 = vld [vmem:[%s2056_s1 + $0xa8] sm:$0xff] }
  0x1a   : > { %v330_v42 = vld [vmem:[%s2057_s2 + $0x88] sm:$0xff]  ;;  %v329_v43 = vld [vmem:[%s2057_s2 + $0x80] sm:$0xff]  ;;  %v279_v44 = vld [vmem:[%s2056_s1 + $0x30] sm:$0xff] }
  0x1b   : > { %1275 = vmatpush1.bf16.msra.mxu0 %v1274_v17  ;;  %1279 = vmatpush1.bf16.msra.mxu1 %v1274_v17  ;;  %v295_v45 = vld [vmem:[%s2056_s1 + $0xb0] sm:$0xff]  ;;  %v332_v46 = vld [vmem:[%s2057_s2 + $0x98] sm:$0xff]  ;;  %v334_v50 = vld [vmem:[%s2057_s2 + $0xa8] sm:$0xff] }
  0x1c   : > { %v331_v47 = vld [vmem:[%s2057_s2 + $0x90] sm:$0xff]  ;;  %v280_v48 = vld [vmem:[%s2056_s1 + $0x38] sm:$0xff]  ;;  %v333_v51 = vld [vmem:[%s2057_s2 + $0xa0] sm:$0xff] }
  0x1d   : > { %382 = vperm.xlu1 %1307, %v320_v22   ;;  %377 = vperm.xlu0 %1306, %v319_v23   ;;  %v296_v49 = vld [vmem:[%s2056_s1 + $0xb8] sm:$0xff]  ;;  %v281_v52 = vld [vmem:[%s2056_s1 + $0x40] sm:$0xff]  ;;  %v335_v55 = vld [vmem:[%s2057_s2 + $0xb0] sm:$0xff] }
  0x1e   : > { %1231 = vmatmul.mubr.msk.f32.vlgmr.msra.gmra.mrb[0].mxu0 %vm505_vm0, %v273_v20  ;;  %1247 = vmatmul.mubr.msk.f32.vlgmr.msra.gmra.mrb[0].mxu1 %vm505_vm0, %v289_v21  ;;  %v297_v53 = vld [vmem:[%s2056_s1 + $0xc0] sm:$0xff]  ;;  %v336_v54 = vld [vmem:[%s2057_s2 + $0xb8] sm:$0xff]  ;;  %v282_v56 = vld [vmem:[%s2056_s1 + $0x48] sm:$0xff] }
  0x1f   : > { %672 = vmatprep.mubr.f32.mxu0 %v1332_v0  ;;  %768 = vmatprep.mubr.f32.mxu1 %v1332_v0  ;;  %v298_v57 = vld [vmem:[%s2056_s1 + $0xc8] sm:$0xff]  ;;  %v337_v59 = vld [vmem:[%s2057_s2 + $0xc0] sm:$0xff]  ;;  %v283_v60 = vld [vmem:[%s2056_s1 + $0x50] sm:$0xff] }
  0x20   : > { %v338_v58 = vld [vmem:[%s2057_s2 + $0xc8] sm:$0xff]  ;;  %v299_v61 = vld [vmem:[%s2056_s1 + $0xd0] sm:$0xff]  ;;  %v340_v62 = vld [vmem:[%s2057_s2 + $0xd8] sm:$0xff] }
  0x21   : > { %392 = vperm.xlu1 %1307, %v322_v26   ;;  %387 = vperm.xlu0 %1306, %v321_v27   ;;  %v339_v63 = vld [vmem:[%s2057_s2 + $0xd0] sm:$0xff]  ;;  %v284_v1 = vld [vmem:[%s2056_s1 + $0x58] sm:$0xff]  ;;  %v342_v3 = vld [vmem:[%s2057_s2 + $0xe8] sm:$0xff] }
  0x22   : > { %1232 = vmatmul.mubr.msk.f32.gmra.mrb[2].mxu0 %vm505_vm0, %v274_v24  ;;  %1248 = vmatmul.mubr.msk.f32.gmra.mrb[2].mxu1 %vm505_vm0, %v290_v25  ;;  %v300_v2 = vld [vmem:[%s2056_s1 + $0xd8] sm:$0xff]  ;;  %v341_v4 = vld [vmem:[%s2057_s2 + $0xe0] sm:$0xff]  ;;  %v343_v8 = vld [vmem:[%s2057_s2 + $0xf0] sm:$0xff] }
  0x23   : > { %678 = vmatprep.mubr.f32.mxu0 %v1332_v0  ;;  %774 = vmatprep.mubr.f32.mxu1 %v1332_v0  ;;  %v285_v5 = vld [vmem:[%s2056_s1 + $0x60] sm:$0xff]  ;;  %v344_v7 = vld [vmem:[%s2057_s2 + $0xf8] sm:$0xff]  ;;  %v286_v9 = vld [vmem:[%s2056_s1 + $0x68] sm:$0xff] }
  0x24   : > { %v301_v6 = vld [vmem:[%s2056_s1 + $0xe0] sm:$0xff]  ;;  %v302_v10 = vld [vmem:[%s2056_s1 + $0xe8] sm:$0xff]  ;;  %v287_v11 = vld [vmem:[%s2056_s1 + $0x70] sm:$0xff] }
  0x25   : > { %402 = vperm.xlu1 %1307, %v324_v30   ;;  %397 = vperm.xlu0 %1306, %v323_v31   ;;  %v303_v12 = vld [vmem:[%s2056_s1 + $0xf0] sm:$0xff]  ;;  %v288_v13 = vld [vmem:[%s2056_s1 + $0x78] sm:$0xff] }
  0x26   : > { %1233 = vmatmul.mubr.msk.f32.gmra.mrb[4].mxu0 %vm505_vm0, %v275_v28  ;;  %1249 = vmatmul.mubr.msk.f32.gmra.mrb[4].mxu1 %vm505_vm0, %v291_v29  ;;  %v304_v14 = vld [vmem:[%s2056_s1 + $0xf8] sm:$0xff] }
  0x27   : > { %684 = vmatprep.mubr.f32.mxu0 %v1332_v0  ;;  %780 = vmatprep.mubr.f32.mxu1 %v1332_v0 }
  0x29   : > { %412 = vperm.xlu1 %1307, %v326_v34   ;;  %407 = vperm.xlu0 %1306, %v325_v35  }
  0x2a   : > { %1234 = vmatmul.mubr.msk.f32.gmra.mrb[6].mxu0 %vm505_vm0, %v276_v32  ;;  %1250 = vmatmul.mubr.msk.f32.gmra.mrb[6].mxu1 %vm505_vm0, %v292_v33  ;;  %v1678_v32 = vld [vmem:[%s1675_s22] sm:$0xff] }
  0x2b   : > { %690 = vmatprep.mubr.f32.mxu0 %v1332_v0  ;;  %786 = vmatprep.mubr.f32.mxu1 %v1332_v0 }
  0x2d   : > { %422 = vperm.xlu1 %1307, %v328_v38   ;;  %417 = vperm.xlu0 %1306, %v327_v39   ;;  %v1688_v38 = vld [vmem:[%s1675_s22 + $0x8] sm:$0xff] }
  0x2e   : > { %1235 = vmatmul.mubr.msk.f32.gmra.mrb[8].mxu0 %vm505_vm0, %v277_v36  ;;  %1251 = vmatmul.mubr.msk.f32.gmra.mrb[8].mxu1 %vm505_vm0, %v293_v37  ;;  %v1685_v36 = vld [vmem:[%s1675_s22 + $0x100] sm:$0xff] }
  0x2f   : > { %696 = vmatprep.mubr.f32.mxu0 %v1332_v0  ;;  %792 = vmatprep.mubr.f32.mxu1 %v1332_v0 }
  0x31   : > { %432 = vperm.xlu1 %1307, %v330_v42   ;;  %427 = vperm.xlu0 %1306, %v329_v43   ;;  %v1698_v43 = vld [vmem:[%s1675_s22 + $0x10] sm:$0xff] }
  0x32   : > { %1236 = vmatmul.mubr.msk.f32.gmra.mrb[10].mxu0 %vm505_vm0, %v278_v40  ;;  %1252 = vmatmul.mubr.msk.f32.gmra.mrb[10].mxu1 %vm505_vm0, %v294_v41  ;;  %v1691_v40 = vld [vmem:[%s1675_s22 + $0x108] sm:$0xff] }
  0x33   : > { %702 = vmatprep.mubr.f32.mxu0 %v1332_v0  ;;  %798 = vmatprep.mubr.f32.mxu1 %v1332_v0 }
  0x35   : > { %442 = vperm.xlu1 %1307, %v332_v46   ;;  %437 = vperm.xlu0 %1306, %v331_v47   ;;  %v1707_v46 = vld [vmem:[%s1675_s22 + $0x118] sm:$0xff]  ;;  %v1710_v47 = vld [vmem:[%s1675_s22 + $0x20] sm:$0xff] }
  0x36   : > { %1237 = vmatmul.mubr.msk.f32.gmra.mrb[12].mxu0 %vm505_vm0, %v279_v44  ;;  %1253 = vmatmul.mubr.msk.f32.gmra.mrb[12].mxu1 %vm505_vm0, %v295_v45  ;;  %v1701_v44 = vld [vmem:[%s1675_s22 + $0x110] sm:$0xff]  ;;  %v1704_v45 = vld [vmem:[%s1675_s22 + $0x18] sm:$0xff] }
  0x37   : > { %708 = vmatprep.mubr.f32.mxu0 %v1332_v0  ;;  %804 = vmatprep.mubr.f32.mxu1 %v1332_v0 }
  0x39   : > { %452 = vperm.xlu1 %1307, %v334_v50   ;;  %447 = vperm.xlu0 %1306, %v333_v51   ;;  %v1719_v50 = vld [vmem:[%s1675_s22 + $0x128] sm:$0xff]  ;;  %v1722_v51 = vld [vmem:[%s1675_s22 + $0x30] sm:$0xff] }
  0x3a   : > { %1238 = vmatmul.mubr.msk.f32.gmra.mrb[14].mxu0 %vm505_vm0, %v280_v48  ;;  %1254 = vmatmul.mubr.msk.f32.gmra.mrb[14].mxu1 %vm505_vm0, %v296_v49  ;;  %v1713_v48 = vld [vmem:[%s1675_s22 + $0x120] sm:$0xff]  ;;  %v1716_v49 = vld [vmem:[%s1675_s22 + $0x28] sm:$0xff] }
  0x3b   : > { %714 = vmatprep.mubr.f32.mxu0 %v1332_v0  ;;  %810 = vmatprep.mubr.f32.mxu1 %v1332_v0 }
  0x3d   : > { %462 = vperm.xlu1 %1307, %v336_v54   ;;  %457 = vperm.xlu0 %1306, %v335_v55   ;;  %v1731_v54 = vld [vmem:[%s1675_s22 + $0x138] sm:$0xff]  ;;  %v1734_v55 = vld [vmem:[%s1675_s22 + $0x40] sm:$0xff] }
  0x3e   : > { %1239 = vmatmul.mubr.msk.f32.gmra.mrb[16].mxu0 %vm505_vm0, %v281_v52  ;;  %1255 = vmatmul.mubr.msk.f32.gmra.mrb[16].mxu1 %vm505_vm0, %v297_v53  ;;  %v1725_v52 = vld [vmem:[%s1675_s22 + $0x130] sm:$0xff]  ;;  %v1728_v53 = vld [vmem:[%s1675_s22 + $0x38] sm:$0xff] }
  0x3f   : > { %720 = vmatprep.mubr.f32.mxu0 %v1332_v0  ;;  %816 = vmatprep.mubr.f32.mxu1 %v1332_v0 }
  0x41   : > { %472 = vperm.xlu1 %1307, %v338_v58   ;;  %467 = vperm.xlu0 %1306, %v337_v59   ;;  %v1743_v58 = vld [vmem:[%s1675_s22 + $0x148] sm:$0xff]  ;;  %v1746_v59 = vld [vmem:[%s1675_s22 + $0x50] sm:$0xff] }
  0x42   : > { %1240 = vmatmul.mubr.msk.f32.gmra.mrb[18].mxu0 %vm505_vm0, %v282_v56  ;;  %1256 = vmatmul.mubr.msk.f32.gmra.mrb[18].mxu1 %vm505_vm0, %v298_v57  ;;  %v1737_v56 = vld [vmem:[%s1675_s22 + $0x140] sm:$0xff]  ;;  %v1740_v57 = vld [vmem:[%s1675_s22 + $0x48] sm:$0xff] }
  0x43   : > { %726 = vmatprep.mubr.f32.mxu0 %v1332_v0  ;;  %822 = vmatprep.mubr.f32.mxu1 %v1332_v0 }
  0x45   : > { %482 = vperm.xlu1 %1307, %v340_v62   ;;  %477 = vperm.xlu0 %1306, %v339_v63   ;;  %v1755_v62 = vld [vmem:[%s1675_s22 + $0x158] sm:$0xff]  ;;  %v1758_v63 = vld [vmem:[%s1675_s22 + $0x60] sm:$0xff] }
  0x46   : > { %1241 = vmatmul.mubr.msk.f32.gmra.mrb[20].mxu0 %vm505_vm0, %v283_v60  ;;  %1257 = vmatmul.mubr.msk.f32.gmra.mrb[20].mxu1 %vm505_vm0, %v299_v61  ;;  %v1749_v60 = vld [vmem:[%s1675_s22 + $0x150] sm:$0xff]  ;;  %v1752_v61 = vld [vmem:[%s1675_s22 + $0x58] sm:$0xff] }
  0x47   : > { %732 = vmatprep.mubr.f32.mxu0 %v1332_v0  ;;  %828 = vmatprep.mubr.f32.mxu1 %v1332_v0 }
  0x49   : > { %492 = vperm.xlu1 %1307, %v342_v3   ;;  %487 = vperm.xlu0 %1306, %v341_v4   ;;  %v1767_v3 = vld [vmem:[%s1675_s22 + $0x168] sm:$0xff]  ;;  %v1770_v4 = vld [vmem:[%s1675_s22 + $0x70] sm:$0xff] }
  0x4a   : > { %1242 = vmatmul.mubr.msk.f32.gmra.mrb[22].mxu0 %vm505_vm0, %v284_v1  ;;  %1258 = vmatmul.mubr.msk.f32.gmra.mrb[22].mxu1 %vm505_vm0, %v300_v2  ;;  %v1761_v1 = vld [vmem:[%s1675_s22 + $0x160] sm:$0xff]  ;;  %v1764_v2 = vld [vmem:[%s1675_s22 + $0x68] sm:$0xff] }
  0x4b   : > { %738 = vmatprep.mubr.f32.mxu0 %v1332_v0  ;;  %834 = vmatprep.mubr.f32.mxu1 %v1332_v0 }
  0x4d   : > { %502 = vperm.xlu1 %1307, %v344_v7   ;;  %497 = vperm.xlu0 %1306, %v343_v8   ;;  %v1779_v7 = vld [vmem:[%s1675_s22 + $0x178] sm:$0xff]  ;;  %v1782_v8 = vld [vmem:[%s1675_s22 + $0x80] sm:$0xff] }
  0x4e   : > { %1243 = vmatmul.mubr.msk.f32.gmra.mrb[24].mxu0 %vm505_vm0, %v285_v5  ;;  %1259 = vmatmul.mubr.msk.f32.gmra.mrb[24].mxu1 %vm505_vm0, %v301_v6  ;;  %v1773_v5 = vld [vmem:[%s1675_s22 + $0x170] sm:$0xff]  ;;  %v1776_v6 = vld [vmem:[%s1675_s22 + $0x78] sm:$0xff] }
  0x4f   : > { %744 = vmatprep.mubr.f32.mxu0 %v1332_v0  ;;  %840 = vmatprep.mubr.f32.mxu1 %v1332_v0 }
  0x52   : > { %1244 = vmatmul.mubr.msk.f32.gmra.mrb[26].mxu0 %vm505_vm0, %v286_v9  ;;  %1260 = vmatmul.mubr.msk.f32.gmra.mrb[26].mxu1 %vm505_vm0, %v302_v10  ;;  %v1785_v9 = vld [vmem:[%s1675_s22 + $0x180] sm:$0xff]  ;;  %v1788_v10 = vld [vmem:[%s1675_s22 + $0x88] sm:$0xff] }
  0x53   : > { %750 = vmatprep.mubr.f32.mxu0 %v1332_v0  ;;  %846 = vmatprep.mubr.f32.mxu1 %v1332_v0 }
  0x56   : > { %1245 = vmatmul.mubr.msk.f32.gmra.mrb[28].mxu0 %vm505_vm0, %v287_v11  ;;  %1261 = vmatmul.mubr.msk.f32.gmra.mrb[28].mxu1 %vm505_vm0, %v303_v12  ;;  %v1791_v11 = vld [vmem:[%s1675_s22 + $0x188] sm:$0xff]  ;;  %v1794_v12 = vld [vmem:[%s1675_s22 + $0x90] sm:$0xff] }
  0x57   : > { %756 = vmatprep.mubr.f32.mxu0 %v1332_v0  ;;  %852 = vmatprep.mubr.f32.mxu1 %v1332_v0  ;;  %2072 = vst [vmem:[#allocation8_spill] sm:$0xff] %v1791_v11  ;;  %2073 = vst [vmem:[#allocation9_spill] sm:$0xff] %v1794_v12 }
  0x5a   : > { %1246 = vmatmul.mubr.msk.f32.gmra.mrb[30].mxu0 %vm505_vm0, %v288_v13  ;;  %1262 = vmatmul.mubr.msk.f32.gmra.mrb[30].mxu1 %vm505_vm0, %v304_v14  ;;  %v1797_v13 = vld [vmem:[%s1675_s22 + $0x190] sm:$0xff]  ;;  %v1800_v14 = vld [vmem:[%s1675_s22 + $0x98] sm:$0xff] }
  0x5b   : > { %2074 = vst [vmem:[#allocation10_spill] sm:$0xff] %v1797_v13  ;;  %2075 = vst [vmem:[#allocation11_spill] sm:$0xff] %v1800_v14 }
  0x90   : > { %v348_v15 = vpop.permute.xlu0 %347  ;;  %v1639_v16 = vpop.permute.xlu1 %357 }
  0x94   : > { %v1641_v17 = vpop.permute.xlu0 %352  ;;  %v1643_v0 = vpop.permute.xlu1 %362 }
  0x98   : > { %v1645_v18 = vpop.permute.xlu0 %367  ;;  %v1647_v19 = vpop.permute.xlu1 %372 }
  0x9c   : > { %v1649_v20 = vpop.permute.xlu0 %377  ;;  %v1651_v21 = vpop.permute.xlu1 %382 }
  0xa0   : > { %v1653_v22 = vpop.permute.xlu0 %387  ;;  %v1655_v23 = vpop.permute.xlu1 %392 }
  0xa4   : > { %v1657_v24 = vpop.permute.xlu0 %397  ;;  %v1659_v25 = vpop.permute.xlu1 %402 }
  0xa5   : > { %2066 = vst [vmem:[#allocation2_spill] sm:$0xff] %v1657_v24  ;;  %2067 = vst [vmem:[#allocation3_spill] sm:$0xff] %v1659_v25  ;;  %v1833_v25 = vld [vmem:[%s1675_s22 + $0x1c0] sm:$0xff] }
  0xa6   : > { %2086 = vst [vmem:[#allocation22_spill] sm:$0xff] %v1833_v25  ;;  %v1860_v25 = vld [vmem:[%s1675_s22 + $0xe8] sm:$0xff] }
  0xa7   : > { %2095 = vst [vmem:[#allocation31_spill] sm:$0xff] %v1860_v25 }
  0xa8   : > { %v1661_v26 = vpop.permute.xlu0 %407  ;;  %v1663_v27 = vpop.permute.xlu1 %412 }
  0xa9   : > { %2068 = vst [vmem:[#allocation4_spill] sm:$0xff] %v1661_v26  ;;  %2069 = vst [vmem:[#allocation5_spill] sm:$0xff] %v1663_v27  ;;  %v1827_v27 = vld [vmem:[%s1675_s22 + $0x1b8] sm:$0xff]  ;;  %v1830_v26 = vld [vmem:[%s1675_s22 + $0xc0] sm:$0xff] }
  0xaa   : > { %2084 = vst [vmem:[#allocation20_spill] sm:$0xff] %v1827_v27  ;;  %2085 = vst [vmem:[#allocation21_spill] sm:$0xff] %v1830_v26  ;;  %v1854_v27 = vld [vmem:[%s1675_s22 + $0xe0] sm:$0xff] }
  0xab   : > { %2093 = vst [vmem:[#allocation29_spill] sm:$0xff] %v1854_v27  ;;  %v1857_v26 = vld [vmem:[%s1675_s22 + $0x1e0] sm:$0xff] }
  0xac   : > { %v1665_v28 = vpop.permute.xlu0 %417  ;;  %v1668_v29 = vpop.permute.xlu1 %422  ;;  %2094 = vst [vmem:[#allocation30_spill] sm:$0xff] %v1857_v26 }
  0xad   : > { %2070 = vst [vmem:[#allocation6_spill] sm:$0xff] %v1665_v28  ;;  %2071 = vst [vmem:[#allocation7_spill] sm:$0xff] %v1668_v29  ;;  %v1821_v29 = vld [vmem:[%s1675_s22 + $0x1b0] sm:$0xff]  ;;  %v1824_v28 = vld [vmem:[%s1675_s22 + $0xb8] sm:$0xff] }
  0xae   : > { %2082 = vst [vmem:[#allocation18_spill] sm:$0xff] %v1821_v29  ;;  %2083 = vst [vmem:[#allocation19_spill] sm:$0xff] %v1824_v28  ;;  %v1848_v29 = vld [vmem:[%s1675_s22 + $0xd8] sm:$0xff] }
  0xaf   : > { %2091 = vst [vmem:[#allocation27_spill] sm:$0xff] %v1848_v29  ;;  %v1851_v28 = vld [vmem:[%s1675_s22 + $0x1d8] sm:$0xff]  ;;  %v1871_v29 = vld [vmem:[%s1675_s22 + $0x1f0] sm:$0xff] }
  0xb0   : > { %v428_v30 = vpop.permute.xlu0 %427  ;;  %2092 = vst [vmem:[#allocation28_spill] sm:$0xff] %v1851_v28  ;;  %2098 = vst [vmem:[#allocation34_spill] sm:$0xff] %v1871_v29 }
  0xb4   : > { %v438_v12 = vpop.permute.xlu0 %437 }
  0xf1   : > { %v668_v31 = vpop.f32.mrb[0].mxu0  ;;  %v764_v33 = vpop.f32.mrb[0].mxu1 }
  0xf2   : > { %v1680_v34 = vadd.f32 %v668_v31, %v348_v15  ;;  %v1682_v35 = vadd.f32 %v764_v33, %v428_v30  ;;  %v670_v37 = vpop.f32.mrb[1].mxu0  ;;  %v766_v39 = vpop.f32.mrb[1].mxu1  ;;  %v1809_v31 = vld [vmem:[%s1675_s22 + $0x1a0] sm:$0xff]  ;;  %v1812_v33 = vld [vmem:[%s1675_s22 + $0xa8] sm:$0xff] }
  0xf3   : > { %v1693_v41 = vadd.f32 %v670_v37, %v348_v15  ;;  %v1695_v42 = vadd.f32 %v766_v39, %v428_v30  ;;  %v1803_v15 = vld [vmem:[%s1675_s22 + $0x198] sm:$0xff]  ;;  %v1806_v30 = vld [vmem:[%s1675_s22 + $0xa0] sm:$0xff]  ;;  %2078 = vst [vmem:[#allocation14_spill] sm:$0xff] %v1809_v31  ;;  %2079 = vst [vmem:[#allocation15_spill] sm:$0xff] %v1812_v33 }
  0xf4   : > { %2076 = vst [vmem:[#allocation12_spill] sm:$0xff] %v1803_v15  ;;  %2077 = vst [vmem:[#allocation13_spill] sm:$0xff] %v1806_v30  ;;  %v1815_v37 = vld [vmem:[%s1675_s22 + $0x1a8] sm:$0xff]  ;;  %v1818_v39 = vld [vmem:[%s1675_s22 + $0xb0] sm:$0xff]  ;;  %v433_v30 = vpop.permute.xlu1 %432 }
  0xf5   : > { %2080 = vst [vmem:[#allocation16_spill] sm:$0xff] %v1815_v37  ;;  %2081 = vst [vmem:[#allocation17_spill] sm:$0xff] %v1818_v39  ;;  %v1836_v33 = vld [vmem:[%s1675_s22 + $0xc8] sm:$0xff]  ;;  %v1842_v37 = vld [vmem:[%s1675_s22 + $0xd0] sm:$0xff]  ;;  %v860_v26 = vmax.f32 %v1693_v41, 0.0  ;;  %v892_v25 = vmax.f32 %v1695_v42, 0.0 }
  0xf6   : > { %2087 = vst [vmem:[#allocation23_spill] sm:$0xff] %v1836_v33  ;;  %v1839_v31 = vld [vmem:[%s1675_s22 + $0x1c8] sm:$0xff]  ;;  %2089 = vst [vmem:[#allocation25_spill] sm:$0xff] %v1842_v37  ;;  %v1845_v39 = vld [vmem:[%s1675_s22 + $0x1d0] sm:$0xff]  ;;  %v859_v33 = vmax.f32 %v1680_v34, 0.0  ;;  %v674_v27 = vpop.f32.mrb[2].mxu0 }
  0xf7   : > { %2088 = vst [vmem:[#allocation24_spill] sm:$0xff] %v1839_v31  ;;  %2090 = vst [vmem:[#allocation26_spill] sm:$0xff] %v1845_v39  ;;  %v891_v31 = vmax.f32 %v1682_v35, 0.0  ;;  %v1865_v37 = vld [vmem:[%s1675_s22 + $0x1e8] sm:$0xff]  ;;  %v1868_v39 = vld [vmem:[%s1675_s22 + $0xf0] sm:$0xff]  ;;  %v770_v34 = vpop.f32.mrb[2].mxu1  ;;  %v675_v28 = vadd.f32 %v674_v27, %v1641_v17  ;;  %v988_v42 = vadd.f32 %v1688_v38, %v860_v26  ;;  %v1020_v24 = vadd.f32 %v1691_v40, %v892_v25 }
  0xf8   : > { %2096 = vst [vmem:[#allocation32_spill] sm:$0xff] %v1865_v37  ;;  %2097 = vst [vmem:[#allocation33_spill] sm:$0xff] %v1868_v39  ;;  %v1883_v35 = vld [vmem:[%s1675_s22 + $0xf8] sm:$0xff]  ;;  %v987_v29 = vadd.f32 %v1678_v32, %v859_v33  ;;  %v771_v15 = vadd.f32 %v770_v34, %v433_v30  ;;  %v676_v14 = vpop.f32.mrb[3].mxu0  ;;  %v772_v41 = vpop.f32.mrb[3].mxu1 }
  0xf9   : > { %2099 = vst [vmem:[#allocation35_spill] sm:$0xff] %v1883_v35  ;;  %v1886_v37 = vld [vmem:[%s1675_s22 + $0x1f8] sm:$0xff]  ;;  %v1019_v39 = vadd.f32 %v1685_v36, %v891_v31  ;;  %v677_v35 = vadd.f32 %v676_v14, %v1641_v17  ;;  %v773_v13 = vadd.f32 %v772_v41, %v433_v30  ;;  %v680_v27 = vpop.f32.mrb[4].mxu0  ;;  %v776_v31 = vpop.f32.mrb[4].mxu1 }
  0xfa   : > { %2100 = vst [vmem:[#allocation36_spill] sm:$0xff] %v1886_v37  ;;  %v861_v37 = vmax.f32 %v675_v28, 0.0  ;;  %v893_v11 = vmax.f32 %v771_v15, 0.0  ;;  %1051 = vst [vmem:[%s1878_s25] sm:$0xff] %v987_v29  ;;  %v681_v17 = vadd.f32 %v680_v27, %v1639_v16  ;;  %v777_v38 = vadd.f32 %v776_v31, %v438_v12  ;;  %v682_v28 = vpop.f32.mrb[5].mxu0  ;;  %v778_v29 = vpop.f32.mrb[5].mxu1 }
  0xfb   : > { %1083 = vst [vmem:[%s1878_s25 + $0x100] sm:$0xff] %v1019_v39  ;;  %v862_v32 = vmax.f32 %v677_v35, 0.0  ;;  %v894_v36 = vmax.f32 %v773_v13, 0.0  ;;  %1052 = vst [vmem:[%s1878_s25 + $0x8] sm:$0xff] %v988_v42  ;;  %v683_v14 = vadd.f32 %v682_v28, %v1639_v16  ;;  %v779_v15 = vadd.f32 %v778_v29, %v438_v12  ;;  %v443_v30 = vpop.permute.xlu1 %442 }
  0xfc   : > { %1084 = vst [vmem:[%s1878_s25 + $0x108] sm:$0xff] %v1020_v24  ;;  %v989_v26 = vadd.f32 %v1698_v43, %v861_v37  ;;  %v1021_v25 = vadd.f32 %v1701_v44, %v893_v11  ;;  %v863_v24 = vmax.f32 %v681_v17, 0.0  ;;  %v895_v33 = vmax.f32 %v777_v38, 0.0 }
  0xfd   : > { %v990_v40 = vadd.f32 %v1704_v45, %v862_v32  ;;  %v1022_v13 = vadd.f32 %v1707_v46, %v894_v36  ;;  %v864_v43 = vmax.f32 %v683_v14, 0.0  ;;  %v896_v44 = vmax.f32 %v779_v15, 0.0  ;;  %v686_v11 = vpop.f32.mrb[6].mxu0  ;;  %v782_v37 = vpop.f32.mrb[6].mxu1 }
  0xfe   : > { %1053 = vst [vmem:[%s1878_s25 + $0x10] sm:$0xff] %v989_v26  ;;  %1085 = vst [vmem:[%s1878_s25 + $0x110] sm:$0xff] %v1021_v25  ;;  %v991_v45 = vadd.f32 %v1710_v47, %v863_v24  ;;  %v1023_v46 = vadd.f32 %v1713_v48, %v895_v33  ;;  %v687_v16 = vadd.f32 %v686_v11, %v1643_v0  ;;  %v688_v39 = vpop.f32.mrb[7].mxu0  ;;  %v784_v34 = vpop.f32.mrb[7].mxu1 }
  0xff   : > { %1054 = vst [vmem:[%s1878_s25 + $0x18] sm:$0xff] %v990_v40  ;;  %1086 = vst [vmem:[%s1878_s25 + $0x118] sm:$0xff] %v1022_v13  ;;  %v783_v12 = vadd.f32 %v782_v37, %v443_v30  ;;  %v992_v35 = vadd.f32 %v1716_v49, %v864_v43  ;;  %v1024_v41 = vadd.f32 %v1719_v50, %v896_v44  ;;  %v448_v36 = vpop.permute.xlu0 %447  ;;  %v453_v15 = vpop.permute.xlu1 %452 }
 0x100   : > { %v689_v42 = vadd.f32 %v688_v39, %v1643_v0  ;;  %v785_v32 = vadd.f32 %v784_v34, %v443_v30  ;;  %v865_v27 = vmax.f32 %v687_v16, 0.0  ;;  %1055 = vst [vmem:[%s1878_s25 + $0x20] sm:$0xff] %v991_v45  ;;  %1087 = vst [vmem:[%s1878_s25 + $0x120] sm:$0xff] %v1023_v46 }
 0x101   : > { %v897_v31 = vmax.f32 %v783_v12, 0.0  ;;  %v692_v26 = vpop.f32.mrb[8].mxu0  ;;  %v788_v25 = vpop.f32.mrb[8].mxu1  ;;  %1056 = vst [vmem:[%s1878_s25 + $0x28] sm:$0xff] %v992_v35  ;;  %1088 = vst [vmem:[%s1878_s25 + $0x128] sm:$0xff] %v1024_v41 }
 0x102   : > { %v866_v47 = vmax.f32 %v689_v42, 0.0  ;;  %v898_v48 = vmax.f32 %v785_v32, 0.0  ;;  %v993_v49 = vadd.f32 %v1722_v51, %v865_v27  ;;  %v693_v0 = vadd.f32 %v692_v26, %v1645_v18  ;;  %v694_v38 = vpop.f32.mrb[9].mxu0  ;;  %v790_v28 = vpop.f32.mrb[9].mxu1 }
 0x103   : > { %v1025_v50 = vadd.f32 %v1725_v52, %v897_v31  ;;  %v789_v17 = vadd.f32 %v788_v25, %v448_v36  ;;  %v695_v13 = vadd.f32 %v694_v38, %v1645_v18  ;;  %v791_v14 = vadd.f32 %v790_v28, %v448_v36  ;;  %v458_v39 = vpop.permute.xlu0 %457  ;;  %v463_v25 = vpop.permute.xlu1 %462 }
 0x104   : > { %v994_v29 = vadd.f32 %v1728_v53, %v866_v47  ;;  %v1026_v40 = vadd.f32 %v1731_v54, %v898_v48  ;;  %v867_v30 = vmax.f32 %v693_v0, 0.0  ;;  %1057 = vst [vmem:[%s1878_s25 + $0x30] sm:$0xff] %v993_v49 }
 0x105   : > { %v899_v24 = vmax.f32 %v789_v17, 0.0  ;;  %1089 = vst [vmem:[%s1878_s25 + $0x130] sm:$0xff] %v1025_v50  ;;  %v868_v51 = vmax.f32 %v695_v13, 0.0  ;;  %v900_v52 = vmax.f32 %v791_v14, 0.0  ;;  %v698_v33 = vpop.f32.mrb[10].mxu0  ;;  %v794_v43 = vpop.f32.mrb[10].mxu1 }
 0x106   : > { %1058 = vst [vmem:[%s1878_s25 + $0x38] sm:$0xff] %v994_v29  ;;  %1090 = vst [vmem:[%s1878_s25 + $0x138] sm:$0xff] %v1026_v40  ;;  %v995_v53 = vadd.f32 %v1734_v55, %v867_v30  ;;  %v699_v18 = vadd.f32 %v698_v33, %v1647_v19  ;;  %v795_v44 = vadd.f32 %v794_v43, %v453_v15  ;;  %v700_v11 = vpop.f32.mrb[11].mxu0  ;;  %v796_v37 = vpop.f32.mrb[11].mxu1 }
 0x107   : > { %v1027_v54 = vadd.f32 %v1737_v56, %v899_v24  ;;  %v996_v45 = vadd.f32 %v1740_v57, %v868_v51  ;;  %v1028_v46 = vadd.f32 %v1743_v58, %v900_v52  ;;  %v701_v16 = vadd.f32 %v700_v11, %v1647_v19  ;;  %v468_v30 = vpop.permute.xlu0 %467 }
 0x108   : > { %v797_v12 = vadd.f32 %v796_v37, %v453_v15  ;;  %v869_v34 = vmax.f32 %v699_v18, 0.0  ;;  %v901_v35 = vmax.f32 %v795_v44, 0.0  ;;  %1059 = vst [vmem:[%s1878_s25 + $0x40] sm:$0xff] %v995_v53 }
 0x109   : > { %1091 = vst [vmem:[%s1878_s25 + $0x140] sm:$0xff] %v1027_v54  ;;  %v870_v55 = vmax.f32 %v701_v16, 0.0  ;;  %v704_v41 = vpop.f32.mrb[12].mxu0  ;;  %v800_v42 = vpop.f32.mrb[12].mxu1  ;;  %1060 = vst [vmem:[%s1878_s25 + $0x48] sm:$0xff] %v996_v45 }
 0x10a   : > { %v902_v56 = vmax.f32 %v797_v12, 0.0  ;;  %1092 = vst [vmem:[%s1878_s25 + $0x148] sm:$0xff] %v1028_v46  ;;  %v997_v57 = vadd.f32 %v1746_v59, %v869_v34  ;;  %v1029_v58 = vadd.f32 %v1749_v60, %v901_v35  ;;  %v705_v19 = vadd.f32 %v704_v41, %v1649_v20  ;;  %v706_v36 = vpop.f32.mrb[13].mxu0  ;;  %v802_v27 = vpop.f32.mrb[13].mxu1  ;;  %v2101_v41 = vld [vmem:[#allocation8_spill] sm:$0xff] }
 0x10b   : > { %v801_v32 = vadd.f32 %v800_v42, %v458_v39  ;;  %v998_v31 = vadd.f32 %v1752_v61, %v870_v55  ;;  %v707_v48 = vadd.f32 %v706_v36, %v1649_v20  ;;  %v803_v26 = vadd.f32 %v802_v27, %v458_v39  ;;  %v473_v45 = vpop.permute.xlu1 %472 }
 0x10c   : > { %v1030_v47 = vadd.f32 %v1755_v62, %v902_v56  ;;  %v871_v49 = vmax.f32 %v705_v19, 0.0  ;;  %1061 = vst [vmem:[%s1878_s25 + $0x50] sm:$0xff] %v997_v57  ;;  %1093 = vst [vmem:[%s1878_s25 + $0x150] sm:$0xff] %v1029_v58  ;;  %v478_v19 = vpop.permute.xlu0 %477 }
 0x10d   : > { %v903_v50 = vmax.f32 %v801_v32, 0.0  ;;  %v872_v59 = vmax.f32 %v707_v48, 0.0  ;;  %v904_v60 = vmax.f32 %v803_v26, 0.0  ;;  %v710_v0 = vpop.f32.mrb[14].mxu0  ;;  %v806_v17 = vpop.f32.mrb[14].mxu1  ;;  %1062 = vst [vmem:[%s1878_s25 + $0x58] sm:$0xff] %v998_v31 }
 0x10e   : > { %1094 = vst [vmem:[%s1878_s25 + $0x158] sm:$0xff] %v1030_v47  ;;  %v999_v61 = vadd.f32 %v1758_v63, %v871_v49  ;;  %v711_v20 = vadd.f32 %v710_v0, %v1651_v21  ;;  %v807_v38 = vadd.f32 %v806_v17, %v463_v25  ;;  %v712_v28 = vpop.f32.mrb[15].mxu0  ;;  %v808_v29 = vpop.f32.mrb[15].mxu1  ;;  %v2102_v47 = vld [vmem:[#allocation9_spill] sm:$0xff]  ;;  %v2103_v48 = vld [vmem:[#allocation10_spill] sm:$0xff]  ;;  %v2106_v17 = vld [vmem:[#allocation12_spill] sm:$0xff] }
 0x10f   : > { %v1031_v62 = vadd.f32 %v1761_v1, %v903_v50  ;;  %v1000_v40 = vadd.f32 %v1764_v2, %v872_v59  ;;  %v1032_v13 = vadd.f32 %v1767_v3, %v904_v60  ;;  %v713_v14 = vadd.f32 %v712_v28, %v1651_v21  ;;  %v2105_v60 = vld [vmem:[#allocation11_spill] sm:$0xff] }
 0x110   : > { %v809_v15 = vadd.f32 %v808_v29, %v463_v25  ;;  %v873_v24 = vmax.f32 %v711_v20, 0.0  ;;  %v905_v51 = vmax.f32 %v807_v38, 0.0  ;;  %1063 = vst [vmem:[%s1878_s25 + $0x60] sm:$0xff] %v999_v61  ;;  %v2104_v25 = vld [vmem:[#allocation2_spill] sm:$0xff]  ;;  %v483_v38 = vpop.permute.xlu1 %482 }
 0x111   : > { %1095 = vst [vmem:[%s1878_s25 + $0x160] sm:$0xff] %v1031_v62  ;;  %v874_v63 = vmax.f32 %v713_v14, 0.0  ;;  %v716_v52 = vpop.f32.mrb[16].mxu0  ;;  %v812_v33 = vpop.f32.mrb[16].mxu1  ;;  %1064 = vst [vmem:[%s1878_s25 + $0x68] sm:$0xff] %v1000_v40 }
 0x112   : > { %v906_v1 = vmax.f32 %v809_v15, 0.0  ;;  %1096 = vst [vmem:[%s1878_s25 + $0x168] sm:$0xff] %v1032_v13  ;;  %v1001_v2 = vadd.f32 %v1770_v4, %v873_v24  ;;  %v1033_v3 = vadd.f32 %v1773_v5, %v905_v51  ;;  %v717_v21 = vadd.f32 %v716_v52, %v1653_v22  ;;  %v718_v53 = vpop.f32.mrb[17].mxu0  ;;  %v814_v54 = vpop.f32.mrb[17].mxu1  ;;  %v2108_v51 = vld [vmem:[#allocation14_spill] sm:$0xff] }
 0x113   : > { %v813_v43 = vadd.f32 %v812_v33, %v468_v30  ;;  %v1002_v18 = vadd.f32 %v1776_v6, %v874_v63  ;;  %v719_v11 = vadd.f32 %v718_v53, %v1653_v22  ;;  %v815_v37 = vadd.f32 %v814_v54, %v468_v30  ;;  %v2107_v30 = vld [vmem:[#allocation13_spill] sm:$0xff]  ;;  %v2111_v53 = vld [vmem:[#allocation16_spill] sm:$0xff] }
 0x114   : > { %v1034_v44 = vadd.f32 %v1779_v7, %v906_v1  ;;  %v875_v46 = vmax.f32 %v717_v21, 0.0  ;;  %1065 = vst [vmem:[%s1878_s25 + $0x70] sm:$0xff] %v1001_v2  ;;  %1097 = vst [vmem:[%s1878_s25 + $0x170] sm:$0xff] %v1033_v3  ;;  %v2109_v1 = vld [vmem:[#allocation3_spill] sm:$0xff] }
 0x115   : > { %v907_v16 = vmax.f32 %v813_v43, 0.0  ;;  %v876_v4 = vmax.f32 %v719_v11, 0.0  ;;  %v908_v5 = vmax.f32 %v815_v37, 0.0  ;;  %v722_v12 = vpop.f32.mrb[18].mxu0  ;;  %v818_v39 = vpop.f32.mrb[18].mxu1  ;;  %1066 = vst [vmem:[%s1878_s25 + $0x78] sm:$0xff] %v1002_v18 }
 0x116   : > { %1098 = vst [vmem:[%s1878_s25 + $0x178] sm:$0xff] %v1034_v44  ;;  %v1003_v6 = vadd.f32 %v1782_v8, %v875_v46  ;;  %v723_v22 = vadd.f32 %v722_v12, %v1655_v23  ;;  %v819_v34 = vadd.f32 %v818_v39, %v473_v45  ;;  %v724_v35 = vpop.f32.mrb[19].mxu0  ;;  %v820_v55 = vpop.f32.mrb[19].mxu1  ;;  %v2110_v21 = vld [vmem:[#allocation15_spill] sm:$0xff]  ;;  %v2112_v12 = vld [vmem:[#allocation17_spill] sm:$0xff] }
 0x117   : > { %v1035_v7 = vadd.f32 %v1785_v9, %v907_v16  ;;  %v1004_v56 = vadd.f32 %v1788_v10, %v876_v4  ;;  %v1036_v42 = vadd.f32 %v2101_v41, %v908_v5  ;;  %v725_v57 = vadd.f32 %v724_v35, %v1655_v23  ;;  %v488_v11 = vpop.permute.xlu0 %487  ;;  %v2115_v41 = vld [vmem:[#allocation19_spill] sm:$0xff] }
 0x118   : > { %v821_v58 = vadd.f32 %v820_v55, %v473_v45  ;;  %v877_v32 = vmax.f32 %v723_v22, 0.0  ;;  %v909_v36 = vmax.f32 %v819_v34, 0.0  ;;  %1067 = vst [vmem:[%s1878_s25 + $0x80] sm:$0xff] %v1003_v6  ;;  %v2113_v6 = vld [vmem:[#allocation18_spill] sm:$0xff]  ;;  %v2114_v22 = vld [vmem:[#allocation4_spill] sm:$0xff] }
 0x119   : > { %1099 = vst [vmem:[%s1878_s25 + $0x180] sm:$0xff] %v1035_v7  ;;  %v878_v8 = vmax.f32 %v725_v57, 0.0  ;;  %v728_v27 = vpop.f32.mrb[20].mxu0  ;;  %v824_v31 = vpop.f32.mrb[20].mxu1  ;;  %1068 = vst [vmem:[%s1878_s25 + $0x88] sm:$0xff] %v1004_v56  ;;  %v2116_v57 = vld [vmem:[#allocation20_spill] sm:$0xff] }
 0x11a   : > { %v910_v9 = vmax.f32 %v821_v58, 0.0  ;;  %1100 = vst [vmem:[%s1878_s25 + $0x188] sm:$0xff] %v1036_v42  ;;  %v1005_v10 = vadd.f32 %v2102_v47, %v877_v32  ;;  %v1037_v26 = vadd.f32 %v2103_v48, %v909_v36  ;;  %v729_v23 = vadd.f32 %v728_v27, %v2104_v25  ;;  %v730_v50 = vpop.f32.mrb[21].mxu0  ;;  %v826_v59 = vpop.f32.mrb[21].mxu1  ;;  %v2117_v48 = vld [vmem:[#allocation21_spill] sm:$0xff] }
 0x11b   : > { %v825_v49 = vadd.f32 %v824_v31, %v478_v19  ;;  %v1006_v0 = vadd.f32 %v2105_v60, %v878_v8  ;;  %v731_v62 = vadd.f32 %v730_v50, %v2104_v25  ;;  %v827_v20 = vadd.f32 %v826_v59, %v478_v19  ;;  %v493_v36 = vpop.permute.xlu1 %492  ;;  %v2118_v25 = vld [vmem:[#allocation22_spill] sm:$0xff] }
 0x11c   : > { %v1038_v61 = vadd.f32 %v2106_v17, %v910_v9  ;;  %v879_v28 = vmax.f32 %v729_v23, 0.0  ;;  %1069 = vst [vmem:[%s1878_s25 + $0x90] sm:$0xff] %v1005_v10  ;;  %1101 = vst [vmem:[%s1878_s25 + $0x190] sm:$0xff] %v1037_v26  ;;  %v2120_v17 = vld [vmem:[#allocation23_spill] sm:$0xff] }
 0x11d   : > { %v911_v29 = vmax.f32 %v825_v49, 0.0  ;;  %v880_v40 = vmax.f32 %v731_v62, 0.0  ;;  %v912_v13 = vmax.f32 %v827_v20, 0.0  ;;  %v734_v14 = vpop.f32.mrb[22].mxu0  ;;  %v830_v15 = vpop.f32.mrb[22].mxu1  ;;  %1070 = vst [vmem:[%s1878_s25 + $0x98] sm:$0xff] %v1006_v0 }
 0x11e   : > { %1102 = vst [vmem:[%s1878_s25 + $0x198] sm:$0xff] %v1038_v61  ;;  %v1007_v24 = vadd.f32 %v2107_v30, %v879_v28  ;;  %v735_v52 = vadd.f32 %v734_v14, %v2109_v1  ;;  %v831_v33 = vadd.f32 %v830_v15, %v483_v38  ;;  %v736_v2 = vpop.f32.mrb[23].mxu0  ;;  %v832_v3 = vpop.f32.mrb[23].mxu1  ;;  %v2119_v49 = vld [vmem:[#allocation5_spill] sm:$0xff]  ;;  %v2121_v62 = vld [vmem:[#allocation24_spill] sm:$0xff] }
 0x11f   : > { %v1039_v63 = vadd.f32 %v2108_v51, %v911_v29  ;;  %v1008_v43 = vadd.f32 %v2110_v21, %v880_v40  ;;  %v1040_v54 = vadd.f32 %v2111_v53, %v912_v13  ;;  %v737_v18 = vadd.f32 %v736_v2, %v2109_v1  ;;  %v498_v29 = vpop.permute.xlu0 %497  ;;  %v2122_v51 = vld [vmem:[#allocation25_spill] sm:$0xff]  ;;  %v2123_v1 = vld [vmem:[#allocation26_spill] sm:$0xff]  ;;  %v2125_v53 = vld [vmem:[#allocation27_spill] sm:$0xff] }
 0x120   : > { %v833_v44 = vadd.f32 %v832_v3, %v483_v38  ;;  %v881_v37 = vmax.f32 %v735_v52, 0.0  ;;  %v913_v45 = vmax.f32 %v831_v33, 0.0  ;;  %1071 = vst [vmem:[%s1878_s25 + $0xa0] sm:$0xff] %v1007_v24  ;;  %v2124_v33 = vld [vmem:[#allocation6_spill] sm:$0xff] }
 0x121   : > { %1103 = vst [vmem:[%s1878_s25 + $0x1a0] sm:$0xff] %v1039_v63  ;;  %v882_v46 = vmax.f32 %v737_v18, 0.0  ;;  %v740_v4 = vpop.f32.mrb[24].mxu0  ;;  %v836_v5 = vpop.f32.mrb[24].mxu1  ;;  %1072 = vst [vmem:[%s1878_s25 + $0xa8] sm:$0xff] %v1008_v43  ;;  %v2126_v18 = vld [vmem:[#allocation28_spill] sm:$0xff] }
 0x122   : > { %v914_v16 = vmax.f32 %v833_v44, 0.0  ;;  %1104 = vst [vmem:[%s1878_s25 + $0x1a8] sm:$0xff] %v1040_v54  ;;  %v1009_v39 = vadd.f32 %v2112_v12, %v881_v37  ;;  %v1041_v7 = vadd.f32 %v2113_v6, %v913_v45  ;;  %v741_v34 = vadd.f32 %v740_v4, %v2114_v22  ;;  %v742_v55 = vpop.f32.mrb[25].mxu0  ;;  %v838_v56 = vpop.f32.mrb[25].mxu1  ;;  %v2127_v6 = vld [vmem:[#allocation29_spill] sm:$0xff] }
 0x123   : > { %v837_v35 = vadd.f32 %v836_v5, %v488_v11  ;;  %v1010_v42 = vadd.f32 %v2115_v41, %v882_v46  ;;  %v743_v19 = vadd.f32 %v742_v55, %v2114_v22  ;;  %v839_v32 = vadd.f32 %v838_v56, %v488_v11  ;;  %v503_v45 = vpop.permute.xlu1 %502  ;;  %v2128_v22 = vld [vmem:[#allocation30_spill] sm:$0xff] }
 0x124   : > { %v1042_v58 = vadd.f32 %v2116_v57, %v914_v16  ;;  %v883_v8 = vmax.f32 %v741_v34, 0.0  ;;  %1073 = vst [vmem:[%s1878_s25 + $0xb0] sm:$0xff] %v1009_v39  ;;  %1105 = vst [vmem:[%s1878_s25 + $0x1b0] sm:$0xff] %v1041_v7  ;;  %v2130_v57 = vld [vmem:[#allocation31_spill] sm:$0xff] }
 0x125   : > { %v915_v9 = vmax.f32 %v837_v35, 0.0  ;;  %v884_v27 = vmax.f32 %v743_v19, 0.0  ;;  %v916_v31 = vmax.f32 %v839_v32, 0.0  ;;  %v746_v47 = vpop.f32.mrb[26].mxu0  ;;  %v842_v10 = vpop.f32.mrb[26].mxu1  ;;  %1074 = vst [vmem:[%s1878_s25 + $0xb8] sm:$0xff] %v1010_v42 }
 0x126   : > { %1106 = vst [vmem:[%s1878_s25 + $0x1b8] sm:$0xff] %v1042_v58  ;;  %v1011_v26 = vadd.f32 %v2117_v48, %v883_v8  ;;  %v747_v50 = vadd.f32 %v746_v47, %v2119_v49  ;;  %v843_v59 = vadd.f32 %v842_v10, %v493_v36  ;;  %v748_v60 = vpop.f32.mrb[27].mxu0  ;;  %v844_v0 = vpop.f32.mrb[27].mxu1  ;;  %v2129_v35 = vld [vmem:[#allocation7_spill] sm:$0xff]  ;;  %v2131_v19 = vld [vmem:[#allocation32_spill] sm:$0xff]  ;;  %v2132_v10 = vld [vmem:[#allocation33_spill] sm:$0xff] }
 0x127   : > { %v1043_v23 = vadd.f32 %v2118_v25, %v915_v9  ;;  %v1012_v61 = vadd.f32 %v2120_v17, %v884_v27  ;;  %v1044_v20 = vadd.f32 %v2121_v62, %v916_v31  ;;  %v749_v38 = vadd.f32 %v748_v60, %v2119_v49 }
 0x128   : > { %v845_v28 = vadd.f32 %v844_v0, %v493_v36  ;;  %v885_v40 = vmax.f32 %v747_v50, 0.0  ;;  %v917_v13 = vmax.f32 %v843_v59, 0.0  ;;  %1075 = vst [vmem:[%s1878_s25 + $0xc0] sm:$0xff] %v1011_v26  ;;  %v2133_v26 = vld [vmem:[#allocation34_spill] sm:$0xff]  ;;  %v2135_v50 = vld [vmem:[#allocation36_spill] sm:$0xff] }
 0x129   : > { %1107 = vst [vmem:[%s1878_s25 + $0x1c0] sm:$0xff] %v1043_v23  ;;  %v886_v14 = vmax.f32 %v749_v38, 0.0  ;;  %v752_v30 = vpop.f32.mrb[28].mxu0  ;;  %v848_v24 = vpop.f32.mrb[28].mxu1  ;;  %1076 = vst [vmem:[%s1878_s25 + $0xc8] sm:$0xff] %v1012_v61  ;;  %v2134_v23 = vld [vmem:[#allocation35_spill] sm:$0xff] }
 0x12a   : > { %v918_v15 = vmax.f32 %v845_v28, 0.0  ;;  %1108 = vst [vmem:[%s1878_s25 + $0x1c8] sm:$0xff] %v1044_v20  ;;  %v1013_v63 = vadd.f32 %v2122_v51, %v885_v40  ;;  %v1045_v52 = vadd.f32 %v2123_v1, %v917_v13  ;;  %v753_v2 = vadd.f32 %v752_v30, %v2124_v33  ;;  %v754_v21 = vpop.f32.mrb[29].mxu0  ;;  %v850_v43 = vpop.f32.mrb[29].mxu1 }
 0x12b   : > { %v849_v3 = vadd.f32 %v848_v24, %v498_v29  ;;  %v1014_v54 = vadd.f32 %v2125_v53, %v886_v14  ;;  %v755_v11 = vadd.f32 %v754_v21, %v2124_v33  ;;  %v851_v37 = vadd.f32 %v850_v43, %v498_v29 }
 0x12c   : > { %v1046_v44 = vadd.f32 %v2126_v18, %v918_v15  ;;  %v887_v46 = vmax.f32 %v753_v2, 0.0  ;;  %1077 = vst [vmem:[%s1878_s25 + $0xd0] sm:$0xff] %v1013_v63  ;;  %1109 = vst [vmem:[%s1878_s25 + $0x1d0] sm:$0xff] %v1045_v52 }
 0x12d   : > { %v919_v16 = vmax.f32 %v849_v3, 0.0  ;;  %v888_v4 = vmax.f32 %v755_v11, 0.0  ;;  %v920_v5 = vmax.f32 %v851_v37, 0.0  ;;  %v758_v12 = vpop.f32.mrb[30].mxu0  ;;  %v854_v39 = vpop.f32.mrb[30].mxu1  ;;  %1078 = vst [vmem:[%s1878_s25 + $0xd8] sm:$0xff] %v1014_v54 }
 0x12e   : > { %1110 = vst [vmem:[%s1878_s25 + $0x1d8] sm:$0xff] %v1046_v44  ;;  %v1015_v7 = vadd.f32 %v2127_v6, %v887_v46  ;;  %v759_v55 = vadd.f32 %v758_v12, %v2129_v35  ;;  %v855_v56 = vadd.f32 %v854_v39, %v503_v45  ;;  %v760_v41 = vpop.f32.mrb[31].mxu0  ;;  %v856_v42 = vpop.f32.mrb[31].mxu1 }
 0x12f   : > { %v1047_v34 = vadd.f32 %v2128_v22, %v919_v16  ;;  %v1016_v58 = vadd.f32 %v2130_v57, %v888_v4  ;;  %v1048_v32 = vadd.f32 %v2131_v19, %v920_v5  ;;  %v761_v36 = vadd.f32 %v760_v41, %v2129_v35 }
 0x130   : > { %v857_v8 = vadd.f32 %v856_v42, %v503_v45  ;;  %v889_v9 = vmax.f32 %v759_v55, 0.0  ;;  %v921_v27 = vmax.f32 %v855_v56, 0.0  ;;  %1079 = vst [vmem:[%s1878_s25 + $0xe0] sm:$0xff] %v1015_v7 }
 0x131   : > { %1111 = vst [vmem:[%s1878_s25 + $0x1e0] sm:$0xff] %v1047_v34  ;;  %v890_v31 = vmax.f32 %v761_v36, 0.0  ;;  %1080 = vst [vmem:[%s1878_s25 + $0xe8] sm:$0xff] %v1016_v58 }
 0x132   : > { %v922_v47 = vmax.f32 %v857_v8, 0.0  ;;  %1112 = vst [vmem:[%s1878_s25 + $0x1e8] sm:$0xff] %v1048_v32  ;;  %v1017_v48 = vadd.f32 %v2132_v10, %v889_v9  ;;  %v1049_v25 = vadd.f32 %v2133_v26, %v921_v27 }
 0x133   : > { %v1018_v49 = vadd.f32 %v2134_v23, %v890_v31 }
 0x134   : > { %v1050_v59 = vadd.f32 %v2135_v50, %v922_v47  ;;  %1081 = vst [vmem:[%s1878_s25 + $0xf0] sm:$0xff] %v1017_v48  ;;  %1113 = vst [vmem:[%s1878_s25 + $0x1f0] sm:$0xff] %v1049_v25 }
 0x135   : > { %1082 = vst [vmem:[%s1878_s25 + $0xf8] sm:$0xff] %v1018_v49 }
 0x136   : > { %1114 = vst [vmem:[%s1878_s25 + $0x1f8] sm:$0xff] %v1050_v59 }
 0x137 PF: > { %s14_s17 = sadd.s32 1, %s1330_s17   ;;  %s2136_s15 = smov %s1326_s16 }
 0x138   : > { %p11_p5 = scmp.ge.s32.totalorder %s14_s17, 4   ;;  %s2137_s16 = smov %s2139_s18 }
 0x13a   :  { %13 = sbr.rel (!%p11_p5) target bundleno = 2 (0x2), region = 69 }

</bundles_post_ra>
